<compile_context>
chip_gen: v5e
topology: v5e:2x2
jax: 0.10.0
libtpu: 0.0.40
codegen_flags: <defaults>
</compile_context>

<pallas_src>
import functools

import jax
import jax.numpy as jnp
from jax.experimental import pallas as pl
from jax.experimental.pallas import tpu as pltpu


# ----------------------------- small helpers --------------------------------

def _round_up(x: int, m: int) -> int:
    return (x + m - 1) // m * m


def _is_bf16(dtype) -> bool:
    return jnp.dtype(dtype) == jnp.dtype(jnp.bfloat16)


def _sublane(dtype) -> int:
    # bf16 packs 16 rows per vreg sublane group; f32 packs 8.
    return 16 if _is_bf16(dtype) else 8


def _tpu_vmem_bytes() -> int:
    """Physical VMEM per TensorCore (generation-aware), with a safe fallback."""
    try:
        info = pltpu.get_tpu_info()
        v = getattr(info, "vmem_capacity_bytes", None)
        if v:
            return int(v)
    except Exception:
        pass
    return 64 * 1024 * 1024  # conservative (v7x per-TC)


_PHYS_VMEM = _tpu_vmem_bytes()
# 128 MiB parts (v5e/v6e) -> ~96 MiB limit; 64 MiB part (v7x) -> 48 MiB limit.
_VMEM_LIMIT_BYTES = min(int(0.75 * _PHYS_VMEM), 100 * 1024 * 1024)
# Working-set budgets used when sizing tiles / deciding whether to fuse.
_TILE_VMEM_BUDGET = int(0.6 * _VMEM_LIMIT_BYTES)
_FUSE_VMEM_BUDGET = int(0.6 * _VMEM_LIMIT_BYTES)


def _pick_tile(total: int, unit: int, cap: int) -> int:
    """Largest multiple of `unit` that divides `total` and is <= max(cap, unit)."""
    q = total // unit
    cap_q = max(1, cap // unit)
    best = 1
    for d in range(1, q + 1):
        if q % d == 0 and d <= cap_q:
            best = d
    return best * unit


def _select_linear_tiles(Mp, Kp, Np, in_dtype, out_dtype, budget):
    """Big tiles (amortize ~0.35us/grid-step), shrunk to fit the VMEM budget."""
    isz = jnp.dtype(in_dtype).itemsize
    osz = jnp.dtype(out_dtype).itemsize
    sub = _sublane(in_dtype)
    max_tm, max_tn = 512, 512
    max_tk = 2048 if isz <= 2 else 1024
    while True:
        tm = _pick_tile(Mp, sub, max_tm)
        tn = _pick_tile(Np, 128, max_tn)
        tk = _pick_tile(Kp, 128, max_tk)
        vmem = (2 * (tm * tk + tk * tn) * isz   # double-buffered x & w tiles
                + tm * tn * 4                   # f32 accumulator scratch
                + 2 * tm * tn * osz             # double-buffered output tile
                + 2 * tn * 4)                   # double-buffered bias
        if vmem <= budget:
            return tm, tk, tn
        if max_tk > 128:
            max_tk //= 2
        elif max_tn > 128:
            max_tn //= 2
        elif max_tm > sub:
            max_tm //= 2
        else:
            return tm, tk, tn  # at minimum tiles; rely on vmem_limit_bytes


# --------------------------- tiled single linear ----------------------------

def _linear_kernel(x_ref, w_ref, b_ref, o_ref, acc_ref, *, apply_tanh: bool):
    """Grid = (M/tm, N/tn, K/tk); acc_ref is an f32 accumulator resident across
    the K axis (the out_spec block index ignores k)."""
    k = pl.program_id(2)

    @pl.when(k == 0)
    def _():
        acc_ref[...] = jnp.zeros_like(acc_ref)

    acc_ref[...] += jnp.dot(x_ref[...], w_ref[...],
                            preferred_element_type=jnp.float32)

    # Epilogue once per output tile: f32 bias + optional tanh + lane-dense store.
    @pl.when(k == pl.num_programs(2) - 1)
    def _():
        y = acc_ref[...] + b_ref[...]
        if apply_tanh:
            y = jnp.tanh(y)  # EUP op, once per output tile, off the K path
        o_ref[...] = y.astype(o_ref.dtype)


def _linear_padded(xp, wp, bp, *, apply_tanh: bool, out_dtype):
    """y = xp @ wp + bp on already-padded, already-cast operands.

    xp: (Mp, Kp) compute dtype; wp: (Kp, Np) compute dtype; bp: (1, Np) f32.
    Returns the padded (Mp, Np) result in `out_dtype` (no slicing here).
    """
    Mp, Kp = xp.shape
    Kp2, Np = wp.shape
    assert Kp == Kp2 and bp.shape == (1, Np)

    tm, tk, tn = _select_linear_tiles(Mp, Kp, Np, xp.dtype, out_dtype,
                                      _TILE_VMEM_BUDGET)
    grid = (Mp // tm, Np // tn, Kp // tk)

    isz = jnp.dtype(xp.dtype).itemsize
    osz = jnp.dtype(out_dtype).itemsize
    cost = pl.CostEstimate(
        flops=2 * Mp * Kp * Np,
        transcendentals=Mp * Np if apply_tanh else 0,
        bytes_accessed=(Mp * Kp * isz * grid[1]      # x re-read per N tile
                        + Kp * Np * isz * grid[0]    # w re-read per M tile
                        + Np * 4 * grid[0]           # bias re-read per M tile
                        + Mp * Np * osz),            # output written once
    )

    return pl.pallas_call(
        functools.partial(_linear_kernel, apply_tanh=apply_tanh),
        out_shape=jax.ShapeDtypeStruct((Mp, Np), out_dtype),
        grid=grid,
        in_specs=[
            pl.BlockSpec((tm, tk), lambda i, j, k: (i, k)),
            pl.BlockSpec((tk, tn), lambda i, j, k: (k, j)),
            pl.BlockSpec((1, tn), lambda i, j, k: (0, j)),
        ],
        out_specs=pl.BlockSpec((tm, tn), lambda i, j, k: (i, j)),
        scratch_shapes=[pltpu.VMEM((tm, tn), jnp.float32)],
        compiler_params=pltpu.CompilerParams(
            dimension_semantics=("parallel", "parallel", "arbitrary"),
            vmem_limit_bytes=_VMEM_LIMIT_BYTES),
        cost_estimate=cost,
    )(xp, wp, bp)


# ------------------------------- fused MLP ----------------------------------

def _fused_mlp_kernel(x_ref, w_ref, b_ref, o_ref, act_ref):
    """Grid = (M_tiles, num_layers).  The activation tile stays in the VMEM
    scratch `act_ref` (compute dtype) for the whole stack; only the per-layer
    (Dp, Dp) weight and (1, Dp) bias blocks stream from HBM."""
    l = pl.program_id(1)
    n_layers = pl.num_programs(1)

    @pl.when(l == 0)
    def _():
        act_ref[...] = x_ref[...]  # x is already in the compute dtype

    y = jnp.dot(act_ref[...], w_ref[...], preferred_element_type=jnp.float32)
    y = y + b_ref[...]

    @pl.when(l < n_layers - 1)
    def _():
        # NOTE: correctness of padded lanes relies on tanh(0) == 0 together
        # with zero-padded weights/biases.  Do not swap in an activation with
        # f(0) != 0 without masking the padded lanes.
        act_ref[...] = jnp.tanh(y).astype(act_ref.dtype)

    @pl.when(l == n_layers - 1)
    def _():
        o_ref[...] = y.astype(o_ref.dtype)


def _fused_fits(tm, Dp, compute_dtype, out_dtype) -> bool:
    isz = jnp.dtype(compute_dtype).itemsize
    osz = jnp.dtype(out_dtype).itemsize
    need = (2 * Dp * Dp * isz          # double-buffered weight block
            + 2 * tm * Dp * isz        # double-buffered x tile
            + tm * Dp * isz            # resident activation scratch
            + 2 * tm * Dp * osz        # double-buffered output tile
            + 2 * 2 * Dp * 4)          # double-buffered bias
    return need <= _FUSE_VMEM_BUDGET


def _fused_call(xp, w_all, b_all, tm, out_dtype):
    Mp, Dp = xp.shape
    L = w_all.shape[0]
    m_tiles = Mp // tm
    isz = jnp.dtype(xp.dtype).itemsize
    cost = pl.CostEstimate(
        flops=2 * L * Mp * Dp * Dp,
        transcendentals=(L - 1) * Mp * Dp,
        bytes_accessed=(Mp * Dp * isz                                   # x
                        + m_tiles * (w_all.size * isz + b_all.size * 4)  # w,b per M tile
                        + Mp * Dp * jnp.dtype(out_dtype).itemsize),      # out
    )
    return pl.pallas_call(
        _fused_mlp_kernel,
        out_shape=jax.ShapeDtypeStruct((Mp, Dp), out_dtype),
        grid=(m_tiles, L),
        in_specs=[
            pl.BlockSpec((tm, Dp), lambda i, l: (i, 0)),          # activation
            pl.BlockSpec((None, Dp, Dp), lambda i, l: (l, 0, 0)),  # layer-l W
            pl.BlockSpec((None, 1, Dp), lambda i, l: (l, 0, 0)),   # layer-l b
        ],
        out_specs=pl.BlockSpec((tm, Dp), lambda i, l: (i, 0)),
        scratch_shapes=[pltpu.VMEM((tm, Dp), xp.dtype)],
        compiler_params=pltpu.CompilerParams(
            # M tiles can shard across TensorCores; layers are sequential.
            dimension_semantics=("parallel", "arbitrary"),
            vmem_limit_bytes=_VMEM_LIMIT_BYTES),
        cost_estimate=cost,
    )(xp, w_all, b_all)


# --------------------------- parameter packing -------------------------------

class PackedMLP:
    """Parameters padded + cast once (pack once, forward many times)."""

    def __init__(self, layers, fused, dims, compute_dtype):
        self.layers = layers            # [(wp (Kp,Np) cdt, bp (1,Np) f32), ...]
        self.fused = fused              # None or (w_all, b_all, Dp)
        self.dims = dims                # original feature dims [d0, d1, ..., dL]
        self.compute_dtype = jnp.dtype(compute_dtype)


def _fuse_weight_ok(dims, compute_dtype) -> bool:
    Dp = max(_round_up(d, 128) for d in dims)
    isz = jnp.dtype(compute_dtype).itemsize
    L = len(dims) - 1
    # The (Dp, Dp) weight block is double-buffered by the pipeline.
    if 2 * Dp * Dp * isz > _FUSE_VMEM_BUDGET // 2:
        return False
    # Don't blow up non-uniform stacks with uniform Dp x Dp zero padding
    # (unless the whole padded stack is tiny anyway).
    padded = L * Dp * Dp * isz
    true = sum(dims[i] * dims[i + 1] for i in range(L)) * isz
    if padded > 2 * true and padded > (2 << 20):
        return False
    return True


def pack_mlp(params, *, compute_dtype=jnp.bfloat16):
    """Pad + cast weights/biases once.  `params` is [(w (in,out), b (out,))]."""
    cdt = jnp.dtype(compute_dtype)
    dims = [params[0][0].shape[0]] + [w.shape[1] for (w, _) in params]

    layers = []
    for (w, b) in params:
        K, N = w.shape
        Kp, Np = _round_up(K, 128), _round_up(N, 128)
        wp = jnp.pad(w, ((0, Kp - K), (0, Np - N))).astype(cdt)
        bp = jnp.pad(b, (0, Np - N)).reshape(1, Np).astype(jnp.float32)
        layers.append((wp, bp))

    fused = None
    if _fuse_weight_ok(dims, cdt):
        L = len(params)
        Dp = max(_round_up(d, 128) for d in dims)
        w_all = jnp.zeros((L, Dp, Dp), cdt)
        b_all = jnp.zeros((L, 1, Dp), jnp.float32)
        for l, (w, b) in enumerate(params):
            k, n = w.shape
            w_all = w_all.at[l, :k, :n].set(w.astype(cdt))
            b_all = b_all.at[l, 0, :n].set(b.astype(jnp.float32))
        fused = (w_all, b_all, Dp)

    return PackedMLP(layers, fused, dims, cdt)


# ------------------------------ forward pass ---------------------------------

def mlp_forward(x, packed: PackedMLP, *, prefer_fused: bool = True):
    """Forward identical to the PyTorch MLP: Linear -> Tanh -> ... -> Linear."""
    M, K0 = x.shape
    assert K0 == packed.dims[0]
    cdt = packed.compute_dtype
    sub = _sublane(cdt)
    Mp = _round_up(M, sub)

    # ---- fused (activation-resident) path ----
    if prefer_fused and packed.fused is not None:
        w_all, b_all, Dp = packed.fused
        tm = _pick_tile(Mp, sub, 512)
        if _fused_fits(tm, Dp, cdt, jnp.float32):
            xp = jnp.pad(x.astype(cdt), ((0, Mp - M), (0, Dp - K0)))
            out = _fused_call(xp, w_all, b_all, tm, jnp.float32)
            return out[:M, :packed.dims[-1]]

    # ---- per-layer tiled path (activations stay padded between layers) ----
    Kp0 = packed.layers[0][0].shape[0]
    h = jnp.pad(x.astype(cdt), ((0, Mp - M), (0, Kp0 - K0)))
    L = len(packed.layers)
    for i, (wp, bp) in enumerate(packed.layers):
        assert h.shape[1] == wp.shape[0]
        last = (i == L - 1)
        # Intermediate outputs in the compute dtype (half-width writeback /
        # next-layer read); only the final layer emits f32.
        h = _linear_padded(h, wp, bp, apply_tanh=not last,
                           out_dtype=jnp.float32 if last else cdt)
    return h[:M, :packed.dims[-1]]


# ------------------------------ params / ref ---------------------------------

def init_mlp_params(sizes, key):
    """Deterministic init mimicking torch.nn.Linear's default uniform init.
    Returns [(w, b)] with w of shape (in, out) and b of shape (out,)."""
    params = []
    for i in range(len(sizes) - 1):
        fan_in, fan_out = sizes[i], sizes[i + 1]
        key, kw, kb = jax.random.split(key, 3)
        bound = 1.0 / jnp.sqrt(jnp.float32(fan_in))
        w = jax.random.uniform(kw, (fan_in, fan_out), jnp.float32,
                               minval=-bound, maxval=bound)
        b = jax.random.uniform(kb, (fan_out,), jnp.float32,
                               minval=-bound, maxval=bound)
        params.append((w, b))
    return params


def mlp_reference(x, params):
    n_layers = len(params)
    h = x
    for i, (w, b) in enumerate(params):
        h = h @ w + b
        if i < n_layers - 1:
            h = jnp.tanh(h)
    return h


if __name__ == "__main__":
    # Small shapes consistent with the module: MLP(sizes=(32, 64, 16)),
    # batch of 2 vectors of dim 32.
    sizes = (32, 64, 16)
    batch = 2

    key = jax.random.PRNGKey(0)
    key, kx = jax.random.split(key)
    x = jax.random.normal(kx, (batch, sizes[0]), jnp.float32)
    params = init_mlp_params(sizes, key)

    ref = mlp_reference(x, params)

    # 1) Exact f32 MXU path, per-layer tiled kernels.
    packed_f32 = pack_mlp(params, compute_dtype=jnp.float32)
    out_layered = jax.block_until_ready(
        mlp_forward(x, packed_f32, prefer_fused=False))
    assert out_layered.shape == (batch, sizes[-1])
    assert jnp.allclose(out_layered, ref, atol=1e-4, rtol=1e-4)

    # 2) Exact f32 path, fully fused (activation resident in VMEM).
    out_fused = jax.block_until_ready(
        mlp_forward(x, packed_f32, prefer_fused=True))
    assert jnp.allclose(out_fused, ref, atol=1e-4, rtol=1e-4)

    # 3) Default fast path: bf16 MXU operands + bf16 intermediate activations,
    #    f32 accumulation / bias / tanh epilogue.
    packed_bf16 = pack_mlp(params)  # compute_dtype defaults to bf16
    out_layered_bf16 = jax.block_until_ready(
        mlp_forward(x, packed_bf16, prefer_fused=False))
    assert jnp.allclose(out_layered_bf16, ref, atol=5e-2, rtol=5e-2)

    out_fused_bf16 = jax.block_until_ready(
        mlp_forward(x, packed_bf16, prefer_fused=True))
    assert jnp.allclose(out_fused_bf16, ref, atol=5e-2, rtol=5e-2)

    print("KERNEL_OK")
</pallas_src>

<mosaic_0001>
module attributes {stable_mosaic.version = 11 : i64} {
  func.func @_linear_kernel(%arg0: i32, %arg1: i32, %arg2: i32, %arg3: memref<8x128xf32, #tpu.memory_space<vmem>>, %arg4: memref<128x128xf32, #tpu.memory_space<vmem>>, %arg5: memref<1x128xf32, #tpu.memory_space<vmem>>, %arg6: memref<8x128xf32, #tpu.memory_space<vmem>>, %arg7: memref<8x128xf32, #tpu.memory_space<vmem>>) attributes {dimension_semantics = [#tpu.dimension_semantics<parallel>, #tpu.dimension_semantics<parallel>, #tpu.dimension_semantics<arbitrary>], iteration_bounds = array<i64: 1, 1, 1>, scalar_prefetch = 0 : i64, scratch_operands = 1 : i64, tpu.core_type = #tpu.core_type<tc>, window_params = [{transform_indices = @transform_0, window_bounds = array<i64: 8, 128>}, {transform_indices = @transform_1, window_bounds = array<i64: 128, 128>}, {transform_indices = @transform_2, window_bounds = array<i64: 1, 128>}, {transform_indices = @transform_3, window_bounds = array<i64: 8, 128>}]} {
    %c0_i32 = arith.constant 0 : i32
    %0 = arith.cmpi eq, %arg2, %c0_i32 : i32
    %1 = arith.extui %0 : i1 to i32
    %c0_i32_0 = arith.constant 0 : i32
    %2 = arith.cmpi ne, %1, %c0_i32_0 : i32
    scf.if %2 {
      %cst_10 = arith.constant 0.000000e+00 : f32
      %12 = vector.broadcast %cst_10 : f32 to vector<8x128xf32>
      %c0_11 = arith.constant 0 : index
      %c0_12 = arith.constant 0 : index
      %13 = vector.load %arg7[%c0_11, %c0_12] : memref<8x128xf32, #tpu.memory_space<vmem>>, vector<8x128xf32>
      tpu.vector_store %arg7[%c0_11, %c0_12], %12 {strides = array<i32>} : memref<8x128xf32, #tpu.memory_space<vmem>>, vector<8x128xf32>,
    } else {
    }
    %c0 = arith.constant 0 : index
    %c0_1 = arith.constant 0 : index
    %3 = vector.load %arg7[%c0, %c0_1] : memref<8x128xf32, #tpu.memory_space<vmem>>, vector<8x128xf32>
    %c0_2 = arith.constant 0 : index
    %c0_3 = arith.constant 0 : index
    %4 = vector.load %arg3[%c0_2, %c0_3] : memref<8x128xf32, #tpu.memory_space<vmem>>, vector<8x128xf32>
    %c0_4 = arith.constant 0 : index
    %c0_5 = arith.constant 0 : index
    %5 = vector.load %arg4[%c0_4, %c0_5] : memref<128x128xf32, #tpu.memory_space<vmem>>, vector<128x128xf32>
    %cst = arith.constant dense<0.000000e+00> : vector<8x128xf32>
    %6 = tpu.matmul %4, %5, %cst {dimension_numbers = #tpu.dot_dimension_numbers<[1], [0], [0], [1], [0, 0, 1, 1], [], []>} : vector<8x128xf32>, vector<128x128xf32>, vector<8x128xf32> -> vector<8x128xf32>
    %7 = arith.addf %3, %6 : vector<8x128xf32>
    %c0_6 = arith.constant 0 : index
    %c0_7 = arith.constant 0 : index
    %8 = vector.load %arg7[%c0_6, %c0_7] : memref<8x128xf32, #tpu.memory_space<vmem>>, vector<8x128xf32>
    tpu.vector_store %arg7[%c0_6, %c0_7], %7 {strides = array<i32>} : memref<8x128xf32, #tpu.memory_space<vmem>>, vector<8x128xf32>,
    %c0_i32_8 = arith.constant 0 : i32
    %9 = arith.cmpi eq, %arg2, %c0_i32_8 : i32
    %10 = arith.extui %9 : i1 to i32
    %c0_i32_9 = arith.constant 0 : i32
    %11 = arith.cmpi ne, %10, %c0_i32_9 : i32
    scf.if %11 {
      %c0_10 = arith.constant 0 : index
      %c0_11 = arith.constant 0 : index
      %12 = vector.load %arg7[%c0_10, %c0_11] : memref<8x128xf32, #tpu.memory_space<vmem>>, vector<8x128xf32>
      %c0_12 = arith.constant 0 : index
      %c0_13 = arith.constant 0 : index
      %13 = vector.load %arg5[%c0_12, %c0_13] : memref<1x128xf32, #tpu.memory_space<vmem>>, vector<1x128xf32>
      %14 = vector.broadcast %13 : vector<1x128xf32> to vector<8x128xf32>
      %15 = arith.addf %12, %14 : vector<8x128xf32>
      %16 = math.tanh %15 : vector<8x128xf32>
      %c0_14 = arith.constant 0 : index
      %c0_15 = arith.constant 0 : index
      %17 = vector.load %arg6[%c0_14, %c0_15] : memref<8x128xf32, #tpu.memory_space<vmem>>, vector<8x128xf32>
      tpu.vector_store %arg6[%c0_14, %c0_15], %16 {strides = array<i32>} : memref<8x128xf32, #tpu.memory_space<vmem>>, vector<8x128xf32>,
    } else {
    }
    return
  }
  func.func @transform_0(%arg0: i32, %arg1: i32, %arg2: i32) -> (i32, i32) {
    %c0_i32 = arith.constant 0 : i32
    return %arg0, %arg2 : i32, i32
  }
  func.func @transform_1(%arg0: i32, %arg1: i32, %arg2: i32) -> (i32, i32) {
    %c0_i32 = arith.constant 0 : i32
    return %arg2, %arg1 : i32, i32
  }
  func.func @transform_2(%arg0: i32, %arg1: i32, %arg2: i32) -> (i32, i32) {
    %c0_i32 = arith.constant 0 : i32
    %c0_i32_0 = arith.constant 0 : i32
    return %c0_i32, %arg1 : i32, i32
  }
  func.func @transform_3(%arg0: i32, %arg1: i32, %arg2: i32) -> (i32, i32) {
    %c0_i32 = arith.constant 0 : i32
    return %arg0, %arg1 : i32, i32
  }
}

</mosaic_0001>

<bundles_post_ra>
// kernel: tpu_custom_call.1
= control target key start
LH: loop header
LB: loop body
LE: loop exit
PB: predicated region body
PF: predicated region fallthrough
CT: control target
= control target key end

     0   :  { %8 = vsyncpa [#allocation4], 0  ;;  %s242_s0 = inlined_call_operand.hbm [shape: f32[8,128], index: 0, kind: input, shape index: {}]   ;;  %s243_s1 = inlined_call_operand.hbm [shape: f32[128,128], index: 1, kind: input, shape index: {}]   ;;  %s244_s2 = inlined_call_operand.vmem [shape: f32[1,128], index: 2, kind: input, shape index: {}]   ;;  %s245_s3 = inlined_call_operand.hbm [shape: f32[8,128], index: 3, kind: output, shape index: {}]  }
   0x1   :  { %9 = vsyncpa [#allocation7], 0 }
   0x2   :  { %10 = vsyncpa [#allocation5], 0  ;;  %s16_s14 = sshll.u32 %s242_s0, 4  ;;  %s205_s15 = smov [#allocation3]   ;;  %s17_s14 = int_to_ptr.hbm [resolvable:$true] %s16_s14 }
   0x3   :  { %s18_s16 = sshll.u32 %s205_s15, 4  ;;  %s26_s19 = sshll.u32 %s243_s1, 4  ;;  %s19_s16 = int_to_ptr.vmem [resolvable:$true] %s18_s16  ;;  %s27_s19 = int_to_ptr.hbm [resolvable:$true] %s26_s19 }
   0x4   :  { %21 = dma.hbm_to_vmem [thread:$0]  %s17_s14, 128, %s19_s16, [#allocation4]  }
   0x5   :  { %s206_s20 = smov [#allocation6]   ;;  %s207_s22 = smov 128  }
   0x6   :  { %s28_s21 = sshll.u32 %s206_s20, 4  ;;  %s208_s23 = smov 8   ;;  %s29_s21 = int_to_ptr.vmem [resolvable:$true] %s28_s21 }
   0x7   :  { %34 = dma.hbm_to_vmem [thread:$0]  %s27_s19, 2048, %s29_s21, [#allocation7], %s207_s22, %s207_s22, %s208_s23  }
   0x8   :  { %199 = dma.done.wait [#allocation4], 128  }
   0x9   :  { %200 = vsyncadd [#allocation4], 4294967168 }
   0xa   :  { %201 = dma.done.wait [#allocation7], 2048  }
   0xb   :  { %202 = vsyncadd [#allocation7], 4294965248  ;;  %v67_v0 = vld [vmem:[#allocation6 + $0x78] sm:$0xff]  ;;  %v66_v1 = vld [vmem:[#allocation6 + $0x70] sm:$0xff]  ;;  %s209_s24 = smov [#allocation8]   ;;  %s108_s28 = sshll.u32 %s245_s3, 4  ;;  %s109_s28 = int_to_ptr.hbm [resolvable:$true] %s108_s28 }
   0xc   :  { %68 = vmatpush.msra.mxu0 %v67_v0  ;;  %v65_v2 = vld [vmem:[#allocation6 + $0x68] sm:$0xff]  ;;  %v64_v3 = vld [vmem:[#allocation6 + $0x60] sm:$0xff]  ;;  %v63_v4 = vld [vmem:[#allocation6 + $0x58] sm:$0xff]  ;;  %s106_s25 = sshll.u32 %s209_s24, 4  ;;  %s107_s25 = int_to_ptr.vmem [resolvable:$true] %s106_s25 }
   0xd   :  { %v62_v5 = vld [vmem:[#allocation6 + $0x50] sm:$0xff]  ;;  %v61_v6 = vld [vmem:[#allocation6 + $0x48] sm:$0xff]  ;;  %v60_v7 = vld [vmem:[#allocation6 + $0x40] sm:$0xff] }
   0xe   :  { %69 = vmatpush.msra.mxu0 %v66_v1  ;;  %v59_v8 = vld [vmem:[#allocation6 + $0x38] sm:$0xff]  ;;  %v58_v9 = vld [vmem:[#allocation6 + $0x30] sm:$0xff]  ;;  %v57_v10 = vld [vmem:[#allocation6 + $0x28] sm:$0xff] }
   0xf   :  { %v56_v11 = vld [vmem:[#allocation6 + $0x20] sm:$0xff]  ;;  %v55_v12 = vld [vmem:[#allocation6 + $0x18] sm:$0xff]  ;;  %v54_v13 = vld [vmem:[#allocation6 + $0x10] sm:$0xff] }
  0x10   :  { %70 = vmatpush.msra.mxu0 %v65_v2  ;;  %v53_v14 = vld [vmem:[#allocation6 + $0x8] sm:$0xff]  ;;  %v52_v15 = vld [vmem:[#allocation6] sm:$0xff]  ;;  %v51_v16 = vld [vmem:[#allocation3] sm:$0xff] }
  0x11   :  { %v124_v17 = vld [vmem:[%s244_s2] ss:$0 sm:$0xff] }
  0x12   :  { %71 = vmatpush.msra.mxu0 %v64_v3 }
  0x14   :  { %72 = vmatpush.msra.mxu0 %v63_v4 }
  0x16   :  { %73 = vmatpush.msra.mxu0 %v62_v5 }
  0x18   :  { %74 = vmatpush.msra.mxu0 %v61_v6 }
  0x1a   :  { %75 = vmatpush.msra.mxu0 %v60_v7 }
  0x1c   :  { %76 = vmatpush.msra.mxu0 %v59_v8 }
  0x1e   :  { %77 = vmatpush.msra.mxu0 %v58_v9 }
  0x20   :  { %78 = vmatpush.msra.mxu0 %v57_v10 }
  0x22   :  { %79 = vmatpush.msra.mxu0 %v56_v11 }
  0x24   :  { %80 = vmatpush.msra.mxu0 %v55_v12 }
  0x26   :  { %81 = vmatpush.msra.mxu0 %v54_v13 }
  0x28   :  { %82 = vmatpush.msra.mxu0 %v53_v14 }
  0x2a   :  { %83 = vmatpush.msra.mxu0 %v52_v15 }
  0x2b   :  { %84 = vmatmul.f32.vlgmr.msra.gmra.mxu0 %v51_v16 }
  0xa8   :  { %v85_v18 = vpop.f32.mrf.mxu0 }
  0xa9   :  { %v98_v19 = vadd.f32 %v124_v17, %v85_v18 }
  0xab   :  { %125 = vtanh.f32 %v98_v19 }
  0xb1   :  { %v126_v20 = vpop.eup %125 }
  0xb2   :  { %100 = vst [vmem:[#allocation8] sm:$0xff] %v126_v20 }
  0xb3   :  { %111 = dma.vmem_to_hbm [thread:$0]  %s107_s25, 128, %s109_s28, [#allocation5]  }
  0xb4   :  { %203 = dma.done.wait [#allocation5], 128  }
  0xb5   :  { %204 = vsyncadd [#allocation5], 4294967168 }
  0xb6   :  { %116 = vsyncpa [#allocation4], 1 }
  0xb7   :  { %117 = vsyncpa [#allocation7], 1 }
  0xb8   :  { %118 = vsyncpa [#allocation5], 1 }

</bundles_post_ra>
